<compile_context>
chip_gen: v7x
topology: tpu7x:2x2x1
jax: 0.10.0
libtpu: 0.0.40
codegen_flags: <defaults>
</compile_context>

<pallas_src>
import functools

import numpy as np
import jax
import jax.numpy as jnp
from jax.experimental import pallas as pl
from jax.experimental.pallas import tpu as pltpu


# -----------------------------------------------------------------------------
# Host-side construction of the per-tap "row-GEMM" conv weight matrices.
# -----------------------------------------------------------------------------
def _row_conv_weights(w_hwio, scale, w_in, w_out, stride):
    """3x3 / pad-1 / stride-`stride` conv as R shifted row-GEMMs.

    Returns T of shape (R, stride*w_in*Cin, w_out*Cout) in bf16 such that
        y_row[ho] = sum_r  x_rows[ho + r] @ T[r]
    where x_rows are the H-padded input rows grouped `stride` at a time and
    flattened as (row-in-group, w, cin), and y rows are flattened as (wo, co).
    The W-direction zero padding and the BN scale are folded into T.
    """
    KH, KW, Cin, Cout = w_hwio.shape
    ws = w_hwio.astype(jnp.float32) * scale.reshape(1, 1, 1, Cout).astype(jnp.float32)
    R = -(-KH // stride)                                  # ceil(KH / stride)

    # kh selector per (tap r, row-in-group rloc):  kh = stride*r + rloc
    groups = []
    for r in range(R):
        per = []
        for rloc in range(stride):
            kh = stride * r + rloc
            per.append(ws[kh] if kh < KH else jnp.zeros_like(ws[0]))
        groups.append(jnp.stack(per))
    wg = jnp.stack(groups)                                # (R, stride, KW, Cin, Cout)

    # placement[kw, w, wo] = 1 iff input column w feeds output column wo via
    # tap kw (with pad=1), i.e. w == stride*wo + kw - 1 and 0 <= w < w_in.
    plc = np.zeros((KW, w_in, w_out), np.float32)
    for kw in range(KW):
        for wo in range(w_out):
            w = stride * wo + kw - 1
            if 0 <= w < w_in:
                plc[kw, w, wo] = 1.0

    t = jnp.einsum("rskio,kwq->rswiqo", wg, jnp.asarray(plc))
    return t.reshape(R, stride * w_in * Cin, w_out * Cout).astype(jnp.bfloat16)


# -----------------------------------------------------------------------------
# Fused Pallas kernel: conv1+bn1+relu -> conv2+bn2 (+residual) -> relu
# (one image per grid step; the intermediate activation stays in VMEM)
# -----------------------------------------------------------------------------
def _make_block_kernel(add_residual: bool, Ho: int, R1: int, R2: int):
    def kernel(*refs):
        if add_residual:
            xg_ref, t1_ref, b1_ref, t2_ref, b2_ref, res_ref, out_ref, y1p_ref = refs
        else:
            xg_ref, t1_ref, b1_ref, t2_ref, b2_ref, out_ref, y1p_ref = refs
            res_ref = None

        n1 = t1_ref.shape[2]
        n2 = t2_ref.shape[2]

        # ---- conv1 (+ folded bn1 scale) + bias + relu -----------------------
        acc1 = jnp.zeros((Ho, n1), jnp.float32)
        for r in range(R1):                               # R1 shifted row windows
            a = xg_ref[0, r:r + Ho, :].astype(jnp.bfloat16)
            acc1 += jnp.dot(a, t1_ref[r], preferred_element_type=jnp.float32)
        y1 = jnp.maximum(acc1 + b1_ref[...], 0.0)

        # ---- H halo for conv2: intermediate never leaves VMEM ---------------
        y1p_ref[...] = jnp.zeros_like(y1p_ref)            # zero halo rows
        y1p_ref[8:8 + Ho, :] = y1                         # sublane-aligned store

        # ---- conv2 (+ folded bn2 scale) + bias (+ residual) + relu ----------
        acc2 = jnp.zeros((Ho, n2), jnp.float32)
        for r in range(R2):                               # taps read rows 7, 8, 9
            a = y1p_ref[7 + r:7 + r + Ho, :].astype(jnp.bfloat16)
            acc2 += jnp.dot(a, t2_ref[r], preferred_element_type=jnp.float32)
        acc2 = acc2 + b2_ref[...]
        if add_residual:
            acc2 = acc2 + res_ref[0].astype(jnp.float32)  # bf16 stream, f32 add
        out_ref[0] = jnp.maximum(acc2, 0.0).astype(out_ref.dtype)

    return kernel


# -----------------------------------------------------------------------------
# BasicBlock forward (NCHW API, matching PyTorch semantics; inference-mode BN)
# -----------------------------------------------------------------------------
def basic_block_forward(x_nchw, params, *, stride, remove_skip_connections):
    N, in_planes, H, W = x_nchw.shape
    planes = params["conv1_w"].shape[0]
    eps = 1e-5
    assert stride in (1, 2)
    assert (H + 2) % stride == 0, "need (H + 2) % stride == 0"

    # fold BN (running stats) into per-channel scale/bias
    s1 = params["bn1_gamma"] / jnp.sqrt(params["bn1_var"] + eps)
    bb1 = params["bn1_beta"] - params["bn1_mean"] * s1
    s2 = params["bn2_gamma"] / jnp.sqrt(params["bn2_var"] + eps)
    bb2 = params["bn2_beta"] - params["bn2_mean"] * s2

    # NCHW -> NHWC ; OIHW -> HWIO  (API is NCHW per the PyTorch module)
    x = jnp.transpose(x_nchw, (0, 2, 3, 1))
    w1 = jnp.transpose(params["conv1_w"], (2, 3, 1, 0))
    w2 = jnp.transpose(params["conv2_w"], (2, 3, 1, 0))

    Ho = (H - 1) // stride + 1
    Wo = (W - 1) // stride + 1
    R1 = -(-3 // stride)                                  # row taps for conv1
    R2 = 3                                                # conv2 is stride 1
    G1 = (H + 2) // stride                                # grouped padded rows
    assert G1 == Ho + R1 - 1

    K1 = stride * W * in_planes                           # conv1 row width
    N1 = Wo * planes                                      # intermediate row width
    N2 = Wo * planes                                      # output row width

    # H-pad + group rows: the ONLY data-movement pass over x (no im2col).
    xg = jnp.pad(x, ((0, 0), (1, 1), (0, 0), (0, 0))).reshape(N, G1, K1)

    # conv taps folded into small per-row weight matrices (BN scale folded in)
    T1 = _row_conv_weights(w1, s1, W, Wo, stride)         # (R1, K1, N1) bf16
    T2 = _row_conv_weights(w2, s2, Wo, Wo, 1)             # (3,  N1, N2) bf16
    b1_row = jnp.tile(bb1, Wo).reshape(1, N1).astype(jnp.float32)
    b2_row = jnp.tile(bb2, Wo).reshape(1, N2).astype(jnp.float32)

    inputs = [xg, T1, b1_row, T2, b2_row]
    in_specs = [
        pl.BlockSpec((1, G1, K1), lambda n: (n, 0, 0)),   # per-image input rows
        pl.BlockSpec((R1, K1, N1), lambda n: (0, 0, 0)),  # resident weights
        pl.BlockSpec((1, N1), lambda n: (0, 0)),
        pl.BlockSpec((R2, N1, N2), lambda n: (0, 0, 0)),
        pl.BlockSpec((1, N2), lambda n: (0, 0)),
    ]

    add_res = not remove_skip_connections
    if add_res:
        sc = x
        if stride != 1 or in_planes != planes:
            assert planes > in_planes and (planes - in_planes) % 2 == 0
            sc = sc[:, ::stride, ::stride, :]             # DownSample2D
            pad = (planes - in_planes) // 2
            sc = jnp.pad(sc, ((0, 0), (0, 0), (0, 0), (pad, pad)))  # PadChannel2D
        res = sc.reshape(N, Ho, N2).astype(jnp.bfloat16)  # bf16 stream
        inputs.append(res)
        in_specs.append(pl.BlockSpec((1, Ho, N2), lambda n: (n, 0, 0)))

    out = pl.pallas_call(
        _make_block_kernel(add_res, Ho, R1, R2),
        out_shape=jax.ShapeDtypeStruct((N, Ho, N2), jnp.float32),
        grid_spec=pltpu.PrefetchScalarGridSpec(
            num_scalar_prefetch=0,
            grid=(N,),
            in_specs=in_specs,
            out_specs=pl.BlockSpec((1, Ho, N2), lambda n: (n, 0, 0)),
            # intermediate activation + its 1-row H halo (rows 7 and 8+Ho are
            # the zero padding rows; y1 lives at the aligned offset 8)
            scratch_shapes=[pltpu.VMEM((Ho + 9, N1), jnp.float32)],
        ),
        compiler_params=pltpu.CompilerParams(
            dimension_semantics=("parallel",),
        ),
    )(*inputs)

    out = out.reshape(N, Ho, Wo, planes)
    return jnp.transpose(out, (0, 3, 1, 2))               # back to NCHW


# -----------------------------------------------------------------------------
# Pure-JAX f32 reference (sanity check)
# -----------------------------------------------------------------------------
def _reference_forward(x_nchw, params, *, stride, remove_skip_connections):
    eps = 1e-5
    dn = jax.lax.conv_dimension_numbers(x_nchw.shape, params["conv1_w"].shape,
                                        ("NCHW", "OIHW", "NCHW"))

    def conv(x, w, s):
        return jax.lax.conv_general_dilated(x, w, (s, s), ((1, 1), (1, 1)),
                                            dimension_numbers=dn)

    def bn(x, g, b, m, v):
        sc = (g / jnp.sqrt(v + eps))[None, :, None, None]
        return x * sc + (b - m * g / jnp.sqrt(v + eps))[None, :, None, None]

    out = jax.nn.relu(bn(conv(x_nchw, params["conv1_w"], stride),
                         params["bn1_gamma"], params["bn1_beta"],
                         params["bn1_mean"], params["bn1_var"]))
    out = bn(conv(out, params["conv2_w"], 1),
             params["bn2_gamma"], params["bn2_beta"],
             params["bn2_mean"], params["bn2_var"])
    if not remove_skip_connections:
        in_planes = x_nchw.shape[1]
        planes = params["conv1_w"].shape[0]
        sc = x_nchw
        if stride != 1 or in_planes != planes:
            sc = sc[:, :, ::stride, ::stride]
            pad = (planes - in_planes) // 2
            sc = jnp.pad(sc, ((0, 0), (pad, pad), (0, 0), (0, 0)))
        out = out + sc
    return jax.nn.relu(out)


# -----------------------------------------------------------------------------
if __name__ == "__main__":
    key = jax.random.PRNGKey(0)
    N, in_planes, H, W = 2, 4, 16, 16
    planes, stride = 8, 2      # exercises the DownSample2D + PadChannel2D path
    remove_skip = False

    ks = jax.random.split(key, 11)
    params = {
        "conv1_w": 0.2 * jax.random.normal(ks[0], (planes, in_planes, 3, 3),
                                           jnp.float32),
        "conv2_w": 0.2 * jax.random.normal(ks[1], (planes, planes, 3, 3),
                                           jnp.float32),
        "bn1_gamma": 1.0 + 0.1 * jax.random.normal(ks[2], (planes,), jnp.float32),
        "bn1_beta": 0.1 * jax.random.normal(ks[3], (planes,), jnp.float32),
        "bn1_mean": 0.1 * jax.random.normal(ks[4], (planes,), jnp.float32),
        "bn1_var": 0.5 + jnp.abs(jax.random.normal(ks[5], (planes,), jnp.float32)),
        "bn2_gamma": 1.0 + 0.1 * jax.random.normal(ks[6], (planes,), jnp.float32),
        "bn2_beta": 0.1 * jax.random.normal(ks[7], (planes,), jnp.float32),
        "bn2_mean": 0.1 * jax.random.normal(ks[8], (planes,), jnp.float32),
        "bn2_var": 0.5 + jnp.abs(jax.random.normal(ks[9], (planes,), jnp.float32)),
    }
    x = jax.random.normal(ks[10], (N, in_planes, H, W), jnp.float32)

    fwd = functools.partial(basic_block_forward, stride=stride,
                            remove_skip_connections=remove_skip)
    out = jax.jit(fwd)(x, params)
    out = jax.block_until_ready(out)

    ref = _reference_forward(x, params, stride=stride,
                             remove_skip_connections=remove_skip)
    assert out.shape == (N, planes, H // stride, W // stride), out.shape
    # bf16 MXU inputs / bf16 residual stream -> loosened tolerance vs f32 ref.
    assert jnp.allclose(out, ref, rtol=5e-2, atol=5e-2), "mismatch vs reference"

    print("KERNEL_OK")
</pallas_src>

<mosaic_0001>
module attributes {stable_mosaic.version = 11 : i64} {
  func.func @kernel(%arg0: i32, %arg1: memref<1x9x128xf32, #tpu.memory_space<vmem>>, %arg2: memref<2x128x64xbf16, #tpu.memory_space<vmem>>, %arg3: memref<1x64xf32, #tpu.memory_space<vmem>>, %arg4: memref<3x64x64xbf16, #tpu.memory_space<vmem>>, %arg5: memref<1x64xf32, #tpu.memory_space<vmem>>, %arg6: memref<1x8x64xbf16, #tpu.memory_space<vmem>>, %arg7: memref<1x8x64xf32, #tpu.memory_space<vmem>>, %arg8: memref<17x64xf32, #tpu.memory_space<vmem>>) attributes {dimension_semantics = [#tpu.dimension_semantics<parallel>], iteration_bounds = array<i64: 2>, scalar_prefetch = 0 : i64, scratch_operands = 1 : i64, tpu.core_type = #tpu.core_type<tc>, window_params = [{transform_indices = @transform_0, window_bounds = array<i64: 1, 9, 128>}, {pipeline_mode = #tpu.pipeline_mode<synchronous>, transform_indices = @transform_1, window_bounds = array<i64: 2, 128, 64>}, {pipeline_mode = #tpu.pipeline_mode<synchronous>, transform_indices = @transform_2, window_bounds = array<i64: 1, 64>}, {pipeline_mode = #tpu.pipeline_mode<synchronous>, transform_indices = @transform_3, window_bounds = array<i64: 3, 64, 64>}, {pipeline_mode = #tpu.pipeline_mode<synchronous>, transform_indices = @transform_4, window_bounds = array<i64: 1, 64>}, {transform_indices = @transform_5, window_bounds = array<i64: 1, 8, 64>}, {transform_indices = @transform_6, window_bounds = array<i64: 1, 8, 64>}]} {
    %cst = arith.constant 0.000000e+00 : f32
    %0 = vector.broadcast %cst : f32 to vector<8x64xf32>
    %c0 = arith.constant 0 : index
    %c0_0 = arith.constant 0 : index
    %c0_1 = arith.constant 0 : index
    %1 = vector.load %arg1[%c0, %c0_0, %c0_1] : memref<1x9x128xf32, #tpu.memory_space<vmem>>, vector<1x8x128xf32>
    %2 = vector.shape_cast %1 : vector<1x8x128xf32> to vector<8x128xf32>
    %3 = arith.truncf %2 : vector<8x128xf32> to vector<8x128xbf16>
    %c0_2 = arith.constant 0 : index
    %c0_3 = arith.constant 0 : index
    %c0_4 = arith.constant 0 : index
    %4 = vector.load %arg2[%c0_2, %c0_3, %c0_4] : memref<2x128x64xbf16, #tpu.memory_space<vmem>>, vector<1x128x64xbf16>
    %5 = vector.shape_cast %4 : vector<1x128x64xbf16> to vector<128x64xbf16>
    %cst_5 = arith.constant dense<0.000000e+00> : vector<8x64xf32>
    %6 = tpu.matmul %3, %5, %cst_5 {dimension_numbers = #tpu.dot_dimension_numbers<[1], [0], [0], [1], [0, 0, 1, 1], [], []>} : vector<8x128xbf16>, vector<128x64xbf16>, vector<8x64xf32> -> vector<8x64xf32>
    %7 = arith.addf %0, %6 : vector<8x64xf32>
    %c0_6 = arith.constant 0 : index
    %c1 = arith.constant 1 : index
    %c0_7 = arith.constant 0 : index
    %8 = vector.load %arg1[%c0_6, %c1, %c0_7] : memref<1x9x128xf32, #tpu.memory_space<vmem>>, vector<1x8x128xf32>
    %9 = vector.shape_cast %8 : vector<1x8x128xf32> to vector<8x128xf32>
    %10 = arith.truncf %9 : vector<8x128xf32> to vector<8x128xbf16>
    %c1_8 = arith.constant 1 : index
    %c0_9 = arith.constant 0 : index
    %c0_10 = arith.constant 0 : index
    %11 = vector.load %arg2[%c1_8, %c0_9, %c0_10] : memref<2x128x64xbf16, #tpu.memory_space<vmem>>, vector<1x128x64xbf16>
    %12 = vector.shape_cast %11 : vector<1x128x64xbf16> to vector<128x64xbf16>
    %cst_11 = arith.constant dense<0.000000e+00> : vector<8x64xf32>
    %13 = tpu.matmul %10, %12, %cst_11 {dimension_numbers = #tpu.dot_dimension_numbers<[1], [0], [0], [1], [0, 0, 1, 1], [], []>} : vector<8x128xbf16>, vector<128x64xbf16>, vector<8x64xf32> -> vector<8x64xf32>
    %14 = arith.addf %7, %13 : vector<8x64xf32>
    %c0_12 = arith.constant 0 : index
    %c0_13 = arith.constant 0 : index
    %15 = vector.load %arg3[%c0_12, %c0_13] : memref<1x64xf32, #tpu.memory_space<vmem>>, vector<1x64xf32>
    %16 = vector.broadcast %15 : vector<1x64xf32> to vector<8x64xf32>
    %17 = arith.addf %14, %16 : vector<8x64xf32>
    %cst_14 = arith.constant 0.000000e+00 : f32
    %18 = vector.broadcast %cst_14 : f32 to vector<8x64xf32>
    %19 = arith.maximumf %17, %18 : vector<8x64xf32>
    %cst_15 = arith.constant 0.000000e+00 : f32
    %20 = vector.broadcast %cst_15 : f32 to vector<17x64xf32>
    %c0_16 = arith.constant 0 : index
    %c0_17 = arith.constant 0 : index
    %21 = vector.load %arg8[%c0_16, %c0_17] : memref<17x64xf32, #tpu.memory_space<vmem>>, vector<17x64xf32>
    tpu.vector_store %arg8[%c0_16, %c0_17], %20 {strides = array<i32>} : memref<17x64xf32, #tpu.memory_space<vmem>>, vector<17x64xf32>,
    %c8 = arith.constant 8 : index
    %c0_18 = arith.constant 0 : index
    %22 = vector.load %arg8[%c8, %c0_18] : memref<17x64xf32, #tpu.memory_space<vmem>>, vector<8x64xf32>
    tpu.vector_store %arg8[%c8, %c0_18], %19 {strides = array<i32>} : memref<17x64xf32, #tpu.memory_space<vmem>>, vector<8x64xf32>,
    %cst_19 = arith.constant 0.000000e+00 : f32
    %23 = vector.broadcast %cst_19 : f32 to vector<8x64xf32>
    %c7 = arith.constant 7 : index
    %c0_20 = arith.constant 0 : index
    %24 = vector.load %arg8[%c7, %c0_20] : memref<17x64xf32, #tpu.memory_space<vmem>>, vector<8x64xf32>
    %25 = arith.truncf %24 : vector<8x64xf32> to vector<8x64xbf16>
    %c0_21 = arith.constant 0 : index
    %c0_22 = arith.constant 0 : index
    %c0_23 = arith.constant 0 : index
    %26 = vector.load %arg4[%c0_21, %c0_22, %c0_23] : memref<3x64x64xbf16, #tpu.memory_space<vmem>>, vector<1x64x64xbf16>
    %27 = vector.shape_cast %26 : vector<1x64x64xbf16> to vector<64x64xbf16>
    %cst_24 = arith.constant dense<0.000000e+00> : vector<8x64xf32>
    %28 = tpu.matmul %25, %27, %cst_24 {dimension_numbers = #tpu.dot_dimension_numbers<[1], [0], [0], [1], [0, 0, 1, 1], [], []>} : vector<8x64xbf16>, vector<64x64xbf16>, vector<8x64xf32> -> vector<8x64xf32>
    %29 = arith.addf %23, %28 : vector<8x64xf32>
    %c8_25 = arith.constant 8 : index
    %c0_26 = arith.constant 0 : index
    %30 = vector.load %arg8[%c8_25, %c0_26] : memref<17x64xf32, #tpu.memory_space<vmem>>, vector<8x64xf32>
    %31 = arith.truncf %30 : vector<8x64xf32> to vector<8x64xbf16>
    %c1_27 = arith.constant 1 : index
    %c0_28 = arith.constant 0 : index
    %c0_29 = arith.constant 0 : index
    %32 = vector.load %arg4[%c1_27, %c0_28, %c0_29] : memref<3x64x64xbf16, #tpu.memory_space<vmem>>, vector<1x64x64xbf16>
    %33 = vector.shape_cast %32 : vector<1x64x64xbf16> to vector<64x64xbf16>
    %cst_30 = arith.constant dense<0.000000e+00> : vector<8x64xf32>
    %34 = tpu.matmul %31, %33, %cst_30 {dimension_numbers = #tpu.dot_dimension_numbers<[1], [0], [0], [1], [0, 0, 1, 1], [], []>} : vector<8x64xbf16>, vector<64x64xbf16>, vector<8x64xf32> -> vector<8x64xf32>
    %35 = arith.addf %29, %34 : vector<8x64xf32>
    %c9 = arith.constant 9 : index
    %c0_31 = arith.constant 0 : index
    %36 = vector.load %arg8[%c9, %c0_31] : memref<17x64xf32, #tpu.memory_space<vmem>>, vector<8x64xf32>
    %37 = arith.truncf %36 : vector<8x64xf32> to vector<8x64xbf16>
    %c2 = arith.constant 2 : index
    %c0_32 = arith.constant 0 : index
    %c0_33 = arith.constant 0 : index
    %38 = vector.load %arg4[%c2, %c0_32, %c0_33] : memref<3x64x64xbf16, #tpu.memory_space<vmem>>, vector<1x64x64xbf16>
    %39 = vector.shape_cast %38 : vector<1x64x64xbf16> to vector<64x64xbf16>
    %cst_34 = arith.constant dense<0.000000e+00> : vector<8x64xf32>
    %40 = tpu.matmul %37, %39, %cst_34 {dimension_numbers = #tpu.dot_dimension_numbers<[1], [0], [0], [1], [0, 0, 1, 1], [], []>} : vector<8x64xbf16>, vector<64x64xbf16>, vector<8x64xf32> -> vector<8x64xf32>
    %41 = arith.addf %35, %40 : vector<8x64xf32>
    %c0_35 = arith.constant 0 : index
    %c0_36 = arith.constant 0 : index
    %42 = vector.load %arg5[%c0_35, %c0_36] : memref<1x64xf32, #tpu.memory_space<vmem>>, vector<1x64xf32>
    %43 = vector.broadcast %42 : vector<1x64xf32> to vector<8x64xf32>
    %44 = arith.addf %41, %43 : vector<8x64xf32>
    %c0_37 = arith.constant 0 : index
    %c0_38 = arith.constant 0 : index
    %c0_39 = arith.constant 0 : index
    %45 = vector.load %arg6[%c0_37, %c0_38, %c0_39] : memref<1x8x64xbf16, #tpu.memory_space<vmem>>, vector<1x8x64xbf16>
    %46 = vector.shape_cast %45 : vector<1x8x64xbf16> to vector<8x64xbf16>
    %47 = arith.extf %46 : vector<8x64xbf16> to vector<8x64xf32>
    %48 = arith.addf %44, %47 : vector<8x64xf32>
    %cst_40 = arith.constant 0.000000e+00 : f32
    %49 = vector.broadcast %cst_40 : f32 to vector<8x64xf32>
    %50 = arith.maximumf %48, %49 : vector<8x64xf32>
    %c0_41 = arith.constant 0 : index
    %c0_42 = arith.constant 0 : index
    %c0_43 = arith.constant 0 : index
    %51 = vector.load %arg7[%c0_41, %c0_42, %c0_43] : memref<1x8x64xf32, #tpu.memory_space<vmem>>, vector<1x8x64xf32>
    %52 = vector.shape_cast %51 : vector<1x8x64xf32> to vector<8x64xf32>
    %53 = vector.shape_cast %50 : vector<8x64xf32> to vector<1x8x64xf32>
    tpu.vector_store %arg7[%c0_41, %c0_42, %c0_43], %53 {strides = array<i32>} : memref<1x8x64xf32, #tpu.memory_space<vmem>>, vector<1x8x64xf32>,
    return
  }
  func.func @transform_0(%arg0: i32) -> (i32, i32, i32) {
    %c0_i32 = arith.constant 0 : i32
    %c0_i32_0 = arith.constant 0 : i32
    %c0_i32_1 = arith.constant 0 : i32
    return %arg0, %c0_i32, %c0_i32_0 : i32, i32, i32
  }
  func.func @transform_1(%arg0: i32) -> (i32, i32, i32) {
    %c0_i32 = arith.constant 0 : i32
    %c0_i32_0 = arith.constant 0 : i32
    %c0_i32_1 = arith.constant 0 : i32
    %c0_i32_2 = arith.constant 0 : i32
    return %c0_i32, %c0_i32_0, %c0_i32_1 : i32, i32, i32
  }
  func.func @transform_2(%arg0: i32) -> (i32, i32) {
    %c0_i32 = arith.constant 0 : i32
    %c0_i32_0 = arith.constant 0 : i32
    %c0_i32_1 = arith.constant 0 : i32
    return %c0_i32, %c0_i32_0 : i32, i32
  }
  func.func @transform_3(%arg0: i32) -> (i32, i32, i32) {
    %c0_i32 = arith.constant 0 : i32
    %c0_i32_0 = arith.constant 0 : i32
    %c0_i32_1 = arith.constant 0 : i32
    %c0_i32_2 = arith.constant 0 : i32
    return %c0_i32, %c0_i32_0, %c0_i32_1 : i32, i32, i32
  }
  func.func @transform_4(%arg0: i32) -> (i32, i32) {
    %c0_i32 = arith.constant 0 : i32
    %c0_i32_0 = arith.constant 0 : i32
    %c0_i32_1 = arith.constant 0 : i32
    return %c0_i32, %c0_i32_0 : i32, i32
  }
  func.func @transform_5(%arg0: i32) -> (i32, i32, i32) {
    %c0_i32 = arith.constant 0 : i32
    %c0_i32_0 = arith.constant 0 : i32
    %c0_i32_1 = arith.constant 0 : i32
    return %arg0, %c0_i32, %c0_i32_0 : i32, i32, i32
  }
  func.func @transform_6(%arg0: i32) -> (i32, i32, i32) {
    %c0_i32 = arith.constant 0 : i32
    %c0_i32_0 = arith.constant 0 : i32
    %c0_i32_1 = arith.constant 0 : i32
    return %arg0, %c0_i32, %c0_i32_0 : i32, i32, i32
  }
}

</mosaic_0001>

<bundles_post_ra>
// kernel: tile.13
= control target key start
LH: loop header
LB: loop body
LE: loop exit
PB: predicated region body
PF: predicated region fallthrough
CT: control target
= control target key end

     0   :  { %s22_s0 = inlined_call_operand.vmem [shape: f32[8], index: 0, kind: input, shape index: {}]   ;;  %s23_s1 = inlined_call_operand.vmem [shape: f32[8,8], index: 1, kind: output, shape index: {}]  }
   0x1   :  { %v4_v0 = vld [vmem:[%s22_s0] ss:$0 sm:$0xff] }
   0x2   :  { %5 = vst [vmem:[%s23_s1] sm:$0xff] %v4_v0 }

// kernel: tile.14
= control target key start
LH: loop header
LB: loop body
LE: loop exit
PB: predicated region body
PF: predicated region fallthrough
CT: control target
= control target key end

     0   :  { %s67_s10 = smov 56   ;;  %s68_s11 = smov 40   ;;  %vm3_vm0 = vcmask 64512   ;;  %vm9_vm1 = vcmask 523712   ;;  %vm15_vm2 = vcmask 458112   ;;  %vm21_vm3 = vcmask 392512   ;;  %s111_s0 = inlined_call_operand.vmem [shape: f32[8,8], index: 0, kind: input, shape index: {}]   ;;  %s112_s1 = inlined_call_operand.vmem [shape: f32[1,64], index: 1, kind: output, shape index: {}]  }
   0x1   :  { %v53_v0 = vld [vmem:[%s111_s0 + $0x7] sm:$0x1]   ;;  %v55_v1 = vld [vmem:[%s111_s0 + $0x5] sm:$0x1]   ;;  %v54_v2 = vld [vmem:[%s111_s0 + $0x6] sm:$0x1]  }
   0x2   :  { %7 = vrot.lane.b32.xlu0 %v53_v0, %s67_s10  ;;  %19 = vrot.lane.b32.xlu1 %v55_v1, %s68_s11  ;;  %v56_v3 = vld [vmem:[%s111_s0 + $0x4] sm:$0x1]   ;;  %v2_v4 = vld [vmem:[%s111_s0] sm:$0x1]   ;;  %s69_s18 = smov 48   ;;  %s70_s19 = smov 32  }
   0x3   :  { %4 = vst.msk [vmem:[#allocation0] sm:$0x1] %vm3_vm0, %v2_v4   ;;  %v57_v5 = vld [vmem:[%s111_s0 + $0x3] sm:$0x1]   ;;  %v58_v6 = vld [vmem:[%s111_s0 + $0x2] sm:$0x1]  }
   0x4   :  { %s71_s24 = smov 24   ;;  %s72_s25 = smov 16   ;;  %v59_v7 = vld [vmem:[%s111_s0 + $0x1] sm:$0x1]   ;;  %vm27_vm4 = vcmask 326912   ;;  %vm33_vm5 = vcmask 261312  }
   0x5   :  { %s73_s0 = smov 8   ;;  %vm39_vm6 = vcmask 195712   ;;  %vm45_vm7 = vcmask 130112  }
   0x6   :  { %13 = vrot.lane.b32.xlu0 %v54_v2, %s69_s18  ;;  %25 = vrot.lane.b32.xlu1 %v56_v3, %s70_s19 }
   0xa   :  { %31 = vrot.lane.b32.xlu0 %v57_v5, %s71_s24  ;;  %37 = vrot.lane.b32.xlu1 %v58_v6, %s72_s25 }
   0xe   :  { %43 = vrot.lane.b32.xlu0 %v59_v7, %s73_s0 }
  0x74   :  { %v8_v8 = vpop.permute.xlu0 %7   ;;  %v20_v9 = vpop.permute.xlu1 %19  }
  0x75   :  { %10 = vst.msk [vmem:[#allocation0] sm:$0x1] %vm9_vm1, %v8_v8  }
  0x78   :  { %v14_v10 = vpop.permute.xlu0 %13   ;;  %v26_v11 = vpop.permute.xlu1 %25  }
  0x79   :  { %16 = vst.msk [vmem:[#allocation0] sm:$0x1] %vm15_vm2, %v14_v10  }
  0x7a   :  { %22 = vst.msk [vmem:[#allocation0] sm:$0x1] %vm21_vm3, %v20_v9  }
  0x7b   :  { %28 = vst.msk [vmem:[#allocation0] sm:$0x1] %vm27_vm4, %v26_v11  }
  0x7c   :  { %v32_v12 = vpop.permute.xlu0 %31   ;;  %v38_v13 = vpop.permute.xlu1 %37  }
  0x7d   :  { %34 = vst.msk [vmem:[#allocation0] sm:$0x1] %vm33_vm5, %v32_v12  }
  0x7e   :  { %40 = vst.msk [vmem:[#allocation0] sm:$0x1] %vm39_vm6, %v38_v13  }
  0x80   :  { %v44_v14 = vpop.permute.xlu0 %43  }
  0x81   :  { %46 = vst.msk [vmem:[#allocation0] sm:$0x1] %vm45_vm7, %v44_v14  }
  0x88   :  { %v50_v15 = vld [vmem:[#allocation0] sm:$0x1] }
  0x89   :  { %52 = vst [vmem:[%s112_s1] sm:$0x1] %v50_v15 }

// kernel: basic_block_forward.1
= control target key start
LH: loop header
LB: loop body
LE: loop exit
PB: predicated region body
PF: predicated region fallthrough
CT: control target
= control target key end

     0   :  { %s1077_s21 = smov 0   ;;  %s1244_s0 = inlined_call_operand.vmem [shape: f32[2,9,128], index: 0, kind: input, shape index: {}]   ;;  %s1245_s1 = inlined_call_operand.vmem [shape: bf16[2,128,64], index: 1, kind: input, shape index: {}]   ;;  %s1246_s2 = inlined_call_operand.vmem [shape: f32[1,64], index: 2, kind: input, shape index: {}]   ;;  %s1247_s3 = inlined_call_operand.vmem [shape: bf16[3,64,64], index: 3, kind: input, shape index: {}]   ;;  %s1248_s4 = inlined_call_operand.vmem [shape: f32[1,64], index: 4, kind: input, shape index: {}]   ;;  %s1249_s5 = inlined_call_operand.vmem [shape: bf16[2,8,64], index: 5, kind: input, shape index: {}]   ;;  %s1250_s6 = inlined_call_operand.vmem [shape: f32[2,8,64], index: 6, kind: output, shape index: {}]  }
   0x1 LB: > { %s808_s22 = sadd.s32 4294967295, %s1038_s21   ;;  %p812_p0 = scmp.ge.s32.totalorder %s1038_s21, 1  ;;  %s1038_s21 = sphi %s1077_s21, %s16_s21  }
   0x2   : > { %p221_p1 = scmp.lt.s32.totalorder %s1038_s21, 3 }
   0x4   : > { %p222_p2 = pnand %p812_p0, %p221_p1 }
   0x5   : > { %v1004_v0 = vld [vmem:[%s1245_s1 + $0x40] sm:$0xff] (!%p222_p2)   ;;  %v1040_v1 = vmov (!%p222_p2), 0.0   ;;  %v1006_v3 = vld [vmem:[%s1245_s1 + $0x48] sm:$0xff] (!%p222_p2)   ;;  %vm1041_vm0 = vmmov (!%p222_p2), 0   ;;  %v1008_v5 = vld [vmem:[%s1245_s1 + $0x50] sm:$0xff] (!%p222_p2)   ;;  %p254_p3 = scmp.lt.s32.totalorder (!%p222_p2), %s808_s22, 1 }
   0x6   : > { %225 = sbr.rel (%p222_p2) target bundleno = 504 (0x1f8), region = 44  ;;  %918 = vmatprep.subr.bf16.mxu0 (!%p222_p2), %v1040_v1  ;;  %938 = vmatprep.subr.bf16.mxu1 (!%p222_p2), %v1040_v1  ;;  %v1005_v2 = vld [vmem:[%s1245_s1] sm:$0xff] (!%p222_p2)   ;;  %v1007_v4 = vld [vmem:[%s1245_s1 + $0x8] sm:$0xff] (!%p222_p2)   ;;  %v1009_v6 = vld [vmem:[%s1245_s1 + $0x10] sm:$0xff] (!%p222_p2)   ;;  %vm490_vm1 = vcmask (!%p222_p2), 523264   ;;  %vm493_vm2 = vcmask (!%p222_p2), 516096  }
   0x7   : > { %919 = vmatpush3.bf16.msra.mxu0 (!%p222_p2), %v1004_v0  ;;  %934 = vmatprep.mubr.msk.bf16.mxu0 (!%p222_p2), %vm1041_vm0, %v1040_v1  ;;  %v1010_v7 = vld [vmem:[%s1245_s1 + $0x58] sm:$0xff] (!%p222_p2)   ;;  %v1012_v9 = vld [vmem:[%s1245_s1 + $0x60] sm:$0xff] (!%p222_p2)   ;;  %v1014_v11 = vld [vmem:[%s1245_s1 + $0x68] sm:$0xff] (!%p222_p2)   ;;  %491 = vst.msk [vmem:[#allocation2] sm:$0xff] (!%p222_p2), %vm490_vm1, %v1040_v1 }
   0x8   : > { %939 = vmatpush3.bf16.msra.mxu1 (!%p222_p2), %v1005_v2  ;;  %920 = vmatprep.subr.bf16.mxu0 (!%p222_p2), %v1040_v1  ;;  %v1011_v8 = vld [vmem:[%s1245_s1 + $0x18] sm:$0xff] (!%p222_p2)   ;;  %v1013_v10 = vld [vmem:[%s1245_s1 + $0x20] sm:$0xff] (!%p222_p2)   ;;  %v1015_v12 = vld [vmem:[%s1245_s1 + $0x28] sm:$0xff] (!%p222_p2)   ;;  %492 = vst.msk [vmem:[#allocation2 + $0x8] sm:$0xff] (!%p222_p2), %vm490_vm1, %v1040_v1 }
   0x9   : > { %940 = vmatprep.subr.bf16.mxu1 (!%p222_p2), %v1040_v1  ;;  %954 = vmatprep.mubr.msk.bf16.mxu1 (!%p222_p2), %vm1041_vm0, %v1040_v1  ;;  %v1016_v13 = vld [vmem:[%s1245_s1 + $0x70] sm:$0xff] (!%p222_p2)   ;;  %v1018_v15 = vld [vmem:[%s1245_s1 + $0x78] sm:$0xff] (!%p222_p2)   ;;  %v1020_v21 = vld [vmem:[%s1247_s3 + $0x20] sm:$0xff] (!%p222_p2)   ;;  %494 = vst.msk [vmem:[#allocation2 + $0x10] sm:$0x1] (!%p222_p2), %vm493_vm2, %v1040_v1 }
   0xa   : > { %v1017_v14 = vld [vmem:[%s1245_s1 + $0x30] sm:$0xff] (!%p222_p2)   ;;  %v1019_v17 = vld [vmem:[%s1245_s1 + $0x38] sm:$0xff] (!%p222_p2)   ;;  %v1021_v22 = vld [vmem:[%s1247_s3] sm:$0xff] (!%p222_p2)  }
   0xb   : > { %921 = vmatpush3.bf16.msra.mxu0 (!%p222_p2), %v1006_v3  ;;  %v1022_v23 = vld [vmem:[%s1247_s3 + $0x28] sm:$0xff] (!%p222_p2)   ;;  %v1024_v25 = vld [vmem:[%s1247_s3 + $0x30] sm:$0xff] (!%p222_p2)   ;;  %v1026_v27 = vld [vmem:[%s1247_s3 + $0x38] sm:$0xff] (!%p222_p2)  }
   0xc   : > { %941 = vmatpush3.bf16.msra.mxu1 (!%p222_p2), %v1007_v4  ;;  %922 = vmatprep.subr.bf16.mxu0 (!%p222_p2), %v1040_v1  ;;  %v1023_v24 = vld [vmem:[%s1247_s3 + $0x8] sm:$0xff] (!%p222_p2)   ;;  %v1025_v26 = vld [vmem:[%s1247_s3 + $0x10] sm:$0xff] (!%p222_p2)   ;;  %v1027_v28 = vld [vmem:[%s1247_s3 + $0x18] sm:$0xff] (!%p222_p2)  }
   0xd   : > { %942 = vmatprep.subr.bf16.mxu1 %v1040_v1  ;;  %s1252_s22 = smov (!%p254_p3, %s808_s22), 1  ;;  %v849_v31 = vld [vmem:[%s1246_s2] ss:$0 sm:$0xff]  ;;  %v1029_v46 = vld [vmem:[%s1247_s3 + $0x48] sm:$0xff]   ;;  %v1030_v47 = vld [vmem:[%s1247_s3 + $0x50] sm:$0xff]  }
   0xe   : > { %s884_s23 = sshll.u32 %s1252_s22, 4  ;;  %v1028_v43 = vld [vmem:[%s1247_s3 + $0x40] sm:$0xff]   ;;  %v1031_v48 = vld [vmem:[%s1247_s3 + $0x58] sm:$0xff]   ;;  %s815_s17 = sshll.u32 %s1252_s22, 2 }
   0xf   : > { %923 = vmatpush3.bf16.msra.mxu0 %v1008_v5  ;;  %s258_s8 = scalar_lea.vmem %s1244_s0, %s884_s23  ;;  %s262_s20 = scalar_lea.vmem %s1249_s5, %s815_s17  ;;  %v881_v62 = vld [vmem:[%s1248_s4] ss:$0 sm:$0xff] }
  0x10   : > { %943 = vmatpush3.bf16.msra.mxu1 %v1009_v6  ;;  %924 = vmatprep.subr.bf16.mxu0 %v1040_v1  ;;  %v286_v16 = vld [vmem:[%s258_s8 + $0x1] sm:$0xff]  ;;  %s816_s25 = sshll.u32 %s1252_s22, 3 }
  0x11   : > { %944 = vmatprep.subr.bf16.mxu1 %v1040_v1  ;;  %v268_v18 = vld [vmem:[%s258_s8] sm:$0xff]  ;;  %v287_v19 = vpack.c.bf16 %v286_v16, %v286_v16  ;;  %s266_s28 = scalar_lea.vmem %s1250_s6, %s816_s25 }
  0x12   : > { %v269_v20 = vpack.c.bf16 %v268_v18, %v268_v18  ;;  %v738_v60 = vld [vmem:[%s262_s20] sm:$0xf] }
  0x13   : > { %925 = vmatpush3.bf16.msra.mxu0 %v1010_v7  ;;  %v739_v0 = vunpack.c.l.bf16 %v738_v60 }
  0x14   : > { %945 = vmatpush3.bf16.msra.mxu1 %v1011_v8  ;;  %926 = vmatprep.subr.bf16.mxu0 %v1040_v1 }
  0x15   : > { %946 = vmatprep.subr.bf16.mxu1 %v1040_v1 }
  0x17   : > { %927 = vmatpush3.bf16.msra.mxu0 %v1012_v9 }
  0x18   : > { %947 = vmatpush3.bf16.msra.mxu1 %v1013_v10  ;;  %928 = vmatprep.subr.bf16.mxu0 %v1040_v1 }
  0x19   : > { %948 = vmatprep.subr.bf16.mxu1 %v1040_v1 }
  0x1b   : > { %929 = vmatpush3.bf16.msra.mxu0 %v1014_v11 }
  0x1c   : > { %949 = vmatpush3.bf16.msra.mxu1 %v1015_v12  ;;  %930 = vmatprep.subr.bf16.mxu0 %v1040_v1 }
  0x1d   : > { %950 = vmatprep.subr.bf16.mxu1 %v1040_v1 }
  0x1f   : > { %931 = vmatpush3.bf16.msra.mxu0 %v1016_v13 }
  0x20   : > { %951 = vmatpush3.bf16.msra.mxu1 %v1017_v14  ;;  %932 = vmatprep.subr.bf16.mxu0 %v1040_v1 }
  0x21   : > { %952 = vmatprep.subr.bf16.mxu1 %v1040_v1 }
  0x23   : > { %933 = vmatpush3.bf16.msra.mxu0 %v1018_v15 }
  0x24   : > { %953 = vmatpush3.bf16.msra.mxu1 %v1019_v17  ;;  %958 = vmatprep.subr.bf16.mxu0 %v1040_v1 }
  0x25   : > { %970 = vmatprep.subr.bf16.mxu1 %v1040_v1 }
  0x26   : > { %935 = vmatmul.mubr.bf16.vlgmr.msra.gmra.mrb[0].mxu0 %v287_v19 }
  0x27   : > { %955 = vmatmul.mubr.bf16.vlgmr.msra.gmra.mrb[0].mxu1 %v269_v20  ;;  %966 = vmatprep.mubr.msk.bf16.mxu0 %vm1041_vm0, %v1040_v1 }
  0x28   : > { %978 = vmatprep.mubr.msk.bf16.mxu1 %vm1041_vm0, %v1040_v1  ;;  %959 = vmatpush3.bf16.msra.mxu0 %v1020_v21 }
  0x29   : > { %971 = vmatpush3.bf16.msra.mxu1 %v1021_v22  ;;  %960 = vmatprep.subr.bf16.mxu0 %v1040_v1 }
  0x2a   : > { %972 = vmatprep.subr.bf16.mxu1 %v1040_v1 }
  0x2c   : > { %961 = vmatpush3.bf16.msra.mxu0 %v1022_v23 }
  0x2d   : > { %973 = vmatpush3.bf16.msra.mxu1 %v1023_v24  ;;  %962 = vmatprep.subr.bf16.mxu0 %v1040_v1 }
  0x2e   : > { %974 = vmatprep.subr.bf16.mxu1 %v1040_v1 }
  0x30   : > { %963 = vmatpush3.bf16.msra.mxu0 %v1024_v25 }
  0x31   : > { %975 = vmatpush3.bf16.msra.mxu1 %v1025_v26  ;;  %964 = vmatprep.subr.bf16.mxu0 %v1040_v1 }
  0x32   : > { %976 = vmatprep.subr.bf16.mxu1 %v1040_v1 }
  0x34   : > { %965 = vmatpush3.bf16.msra.mxu0 %v1026_v27 }
  0x35   : > { %977 = vmatpush3.bf16.msra.mxu1 %v1027_v28  ;;  %982 = vmatprep.subr.bf16.mxu0 %v1040_v1 }
  0xf9   : > { %v387_v29 = vpop.f32.mrb[0].mxu0 }
  0xfa   : > { %v475_v30 = vpop.f32.mrb[0].mxu1  ;;  %v936_v32 = vpop.f32.mrb[1].mxu0 }
  0xfb   : > { %v476_v33 = vadd.f32 %v475_v30, %v387_v29  ;;  %v956_v34 = vpop.f32.mrb[1].mxu1  ;;  %v390_v35 = vpop.f32.mrb[2].mxu0 }
  0xfc   : > { %v478_v36 = vpop.f32.mrb[2].mxu1  ;;  %v937_v37 = vpop.f32.mrb[3].mxu0 }
  0xfd   : > { %v488_v38 = vadd.f32 %v849_v31, %v476_v33  ;;  %v957_v39 = vpop.f32.mrb[3].mxu1 }
  0xff   : > { %v489_v40 = vmax.f32 %v488_v38, 0.0 }
 0x101   : > { %495 = vst.msk [vmem:[#allocation2 + $0x8] sm:$0xff] %vm490_vm1, %v489_v40 }
 0x108   : > { %v506_v41 = vld [vmem:[#allocation2 + $0x8] sm:$0xff] }
 0x109   : > { %v496_v42 = vld [vmem:[#allocation2 + $0x7] sm:$0xff]  ;;  %v507_v44 = vpack.c.bf16 %v506_v41, %v506_v41 }
 0x10a   : > { %v497_v45 = vpack.c.bf16 %v496_v42, %v496_v42  ;;  %v651_v49 = vld [vmem:[#allocation2 + $0x9] sm:$0xff] }
 0x10b   : > { %967 = vmatmul.mubr.msk.bf16.vlgmr.msra.gmra.mrb[4].mxu0 %vm490_vm1, %v507_v44  ;;  %v652_v50 = vpack.c.bf16 %v651_v49, %v651_v49 }
 0x10c   : > { %979 = vmatmul.mubr.msk.bf16.vlgmr.msra.gmra.mrb[4].mxu1 %vm490_vm1, %v497_v45  ;;  %983 = vmatpush3.bf16.msra.mxu0 %v1028_v43 }
 0x10d   : > { %990 = vmatprep.mubr.msk.bf16.mxu0 %vm1041_vm0, %v1040_v1  ;;  %984 = vmatprep.subr.bf16.mxu0 %v1040_v1 }
 0x110   : > { %985 = vmatpush3.bf16.msra.mxu0 %v1029_v46 }
 0x111   : > { %986 = vmatprep.subr.bf16.mxu0 %v1040_v1 }
 0x114   : > { %987 = vmatpush3.bf16.msra.mxu0 %v1030_v47 }
 0x115   : > { %988 = vmatprep.subr.bf16.mxu0 %v1040_v1 }
 0x118   : > { %989 = vmatpush3.bf16.msra.mxu0 %v1031_v48 }
 0x11b   : > { %991 = vmatmul.mubr.msk.bf16.vlgmr.msra.gmra.mrb[8].mxu0 %vm490_vm1, %v652_v50 }
 0x1de   : > { %v578_v51 = vpop.f32.mrb[4].mxu0 }
 0x1df   : > { %v645_v52 = vpop.f32.mrb[4].mxu1  ;;  %v968_v54 = vpop.f32.mrb[5].mxu0 }
 0x1e0   : > { %v646_v53 = vadd.f32 %v645_v52, %v578_v51  ;;  %v980_v55 = vpop.f32.mrb[5].mxu1  ;;  %v581_v56 = vpop.f32.mrb[6].mxu0 }
 0x1e1   : > { %v648_v57 = vpop.f32.mrb[6].mxu1  ;;  %v969_v58 = vpop.f32.mrb[7].mxu0 }
 0x1e2   : > { %v981_v59 = vpop.f32.mrb[7].mxu1 }
 0x1ee   : > { %v723_v61 = vpop.f32.mrb[8].mxu0 }
 0x1ef   : > { %v729_v63 = vadd.f32 %v723_v61, %v646_v53  ;;  %v992_v1 = vpop.f32.mrb[9].mxu0 }
 0x1f0   : > { %v726_v2 = vpop.f32.mrb[10].mxu0 }
 0x1f1   : > { %v737_v3 = vadd.f32 %v881_v62, %v729_v63  ;;  %v993_v4 = vpop.f32.mrb[11].mxu0 }
 0x1f3   : > { %v740_v5 = vadd.f32 %v739_v0, %v737_v3 }
 0x1f5   : > { %v741_v6 = vmax.f32 %v740_v5, 0.0 }
 0x1f7   : > { %742 = vst.msk [vmem:[%s266_s28] sm:$0xff] %vm490_vm1, %v741_v6 }
 0x1f8 PF: > { %s16_s21 = sadd.s32 1, %s1038_s21  }
 0x1f9   : > { %p13_p4 = scmp.ge.s32.totalorder %s16_s21, 4  }
 0x1fb   :  { %15 = sbr.rel (!%p13_p4) target bundleno = 1 (0x1), region = 80 }

</bundles_post_ra>
